<compile_context>
chip_gen: v6e
topology: v6e:2x2x1
jax: 0.10.0
libtpu: 0.0.40
codegen_flags: <defaults>
</compile_context>

<pallas_src>
import math
import functools

import jax
import jax.numpy as jnp
from jax.experimental import pallas as pl
from jax.experimental.pallas import tpu as pltpu

MIN_NORM = 1e-15
PROJ_EPS = 4e-3          # PoincareBall eps for float32
ARTANH_EPS = 1e-15       # mirrors PyTorch float32 clamp (no-op in f32, kept for parity)


def _round_up(x, m):
    return (x + m - 1) // m * m


def _norm(v):
    return jnp.maximum(jnp.sqrt(jnp.sum(v * v, axis=-1, keepdims=True)), MIN_NORM)


def _proj(v, sqrt_c):
    # Project back onto the open ball of radius (1 - eps)/sqrt(c).
    norm = _norm(v)
    maxnorm = (1.0 - PROJ_EPS) / sqrt_c
    return jnp.where(norm > maxnorm, v / norm * maxnorm, v)


def _artanh(x):
    x = jnp.clip(x, -1.0 + ARTANH_EPS, 1.0 - ARTANH_EPS)
    return 0.5 * jnp.log((1.0 + x) / (1.0 - x))


def hyplinear_kernel(x_ref, w_ref, hb_ref, o_ref, *, c, use_bias):
    """One row-tile of the HypLinear forward.

    x_ref : (TM, Din_p)     f32 row tile (feature dims lane-padded to 128)
    w_ref : (Din_p, Dout_p) pre-transposed weight (f32 or bf16 for the MXU)
    hb_ref: (1, Dout_p)     precomputed hyperbolic bias (f32)
    o_ref : (TM, Dout_p)
    """
    c = jnp.float32(c)
    sqrt_c = jnp.sqrt(c)

    x = x_ref[...].astype(jnp.float32)                                 # (TM, Din_p)

    # ---- mobius_matvec(W, x, c) -------------------------------------------
    # Weight arrives pre-transposed: contract the shared last dim directly
    # on the MXU (no in-kernel transpose). f32 accumulation.
    mx = jnp.dot(x.astype(w_ref.dtype), w_ref[...],
                 preferred_element_type=jnp.float32)                   # (TM, Dout_p)

    x_sq = jnp.sum(x * x, axis=-1, keepdims=True)
    x_norm = jnp.maximum(jnp.sqrt(x_sq), MIN_NORM)                     # (TM, 1)
    mx_sq = jnp.sum(mx * mx, axis=-1, keepdims=True)
    mx_norm = jnp.maximum(jnp.sqrt(mx_sq), MIN_NORM)                   # (TM, 1)

    res_c = jnp.tanh(mx_norm / x_norm * _artanh(sqrt_c * x_norm)) * mx / (mx_norm * sqrt_c)
    # Zero-row test reuses the squared sum already needed for mx_norm.
    mv = jnp.where(mx_sq <= 0.0, jnp.float32(0.0), res_c)

    # ---- proj ---------------------------------------------------------------
    res = _proj(mv, sqrt_c)

    if use_bias:
        hb = hb_ref[...].astype(jnp.float32)                           # (1, Dout_p)
        # ---- mobius_add(res, hyp_bias, c) (hyp_bias precomputed in wrapper) --
        x2 = jnp.sum(res * res, axis=-1, keepdims=True)
        y2 = jnp.sum(hb * hb, axis=-1, keepdims=True)
        xy = jnp.sum(res * hb, axis=-1, keepdims=True)
        num = (1.0 + 2.0 * c * xy + c * y2) * res + (1.0 - c * x2) * hb
        denom = jnp.maximum(1.0 + 2.0 * c * xy + c * c * x2 * y2, MIN_NORM)
        # NOTE: pl.reciprocal(approx=True) could move this divide to the EUP,
        # but exact division is kept for bit-fidelity with the reference.
        res = _proj(num / denom, sqrt_c)

    o_ref[...] = res.astype(o_ref.dtype)


def hyp_linear(x, weight, bias, c, use_bias=True, *, tm=256, mxu_dtype=None):
    """x: (N, Din) f32, weight: (Dout, Din), bias: (Dout,).

    mxu_dtype: optional dtype (e.g. jnp.bfloat16) for the MXU matmul operands;
               accumulation and all hyperbolic math stay f32.
    """
    n, din = x.shape
    dout, din_w = weight.shape
    assert din == din_w
    c = float(c)
    sqrt_c = math.sqrt(c)

    # Lane-dense padding of both feature dims (padded zeros do not alter any
    # norm / dot product used by the hyperbolic math).
    din_p = _round_up(din, 128)
    dout_p = _round_up(dout, 128)

    # Row tile: as large as requested, clamped to the (8-aligned) row count;
    # pad N so the grid divides evenly. Padded zero rows are numerically safe
    # and sliced off at the end.
    tm_eff = min(_round_up(max(tm, 8), 8), _round_up(n, 8))
    n_p = _round_up(n, tm_eff)

    x_p = jnp.zeros((n_p, din_p), x.dtype).at[:n, :din].set(x)

    # Pre-transpose the weight (no in-kernel w.T) + optional bf16 cast for MXU.
    w_t = jnp.zeros((din_p, dout_p), jnp.float32).at[:din, :dout].set(
        weight.astype(jnp.float32).T)
    if mxu_dtype is not None:
        w_t = w_t.astype(mxu_dtype)

    # Hoist the loop-invariant hyperbolic bias out of the per-tile body:
    # proj_tan0 is identity for PoincareBall; expmap0 then proj.
    b = bias.reshape(1, dout).astype(jnp.float32)
    b_norm = _norm(b)
    hyp_bias = _proj(jnp.tanh(sqrt_c * b_norm) * b / (sqrt_c * b_norm), sqrt_c)
    hb_p = jnp.zeros((1, dout_p), jnp.float32).at[:, :dout].set(hyp_bias)

    # VMEM budget: double-buffered x/out row tiles + resident weight + bias,
    # plus slack; capped at 64 MiB so the limit is valid on v7x too.
    w_item = jnp.dtype(w_t.dtype).itemsize
    est = (2 * tm_eff * din_p * 4 + 2 * tm_eff * dout_p * 4
           + 2 * din_p * dout_p * w_item + 2 * dout_p * 4)
    vmem_limit = int(min(max(est + (4 << 20), 16 << 20), 64 << 20))

    # TODO(synk): for very large Din, add a K-reduction grid axis (last,
    # "arbitrary") with a (tm, Dout) f32 accumulator scratch and run the
    # nonlinear mobius/proj/bias epilogue under pl.when(k == last).
    kernel = functools.partial(hyplinear_kernel, c=c, use_bias=use_bias)
    out_p = pl.pallas_call(
        kernel,
        out_shape=jax.ShapeDtypeStruct((n_p, dout_p), x.dtype),
        grid_spec=pltpu.PrefetchScalarGridSpec(
            num_scalar_prefetch=0,
            grid=(n_p // tm_eff,),
            in_specs=[
                pl.BlockSpec((tm_eff, din_p), lambda i: (i, 0)),   # x row tile
                # Constant index map -> block stays resident (no re-DMA per step).
                # On v7x (64 MiB VMEM) consider pipeline_mode=pl.Buffered(1)
                # here to drop the second weight buffer.
                pl.BlockSpec((din_p, dout_p), lambda i: (0, 0)),   # weight (Din,Dout)
                pl.BlockSpec((1, dout_p), lambda i: (0, 0)),       # hyp bias
            ],
            out_specs=pl.BlockSpec((tm_eff, dout_p), lambda i: (i, 0)),
        ),
        compiler_params=pltpu.CompilerParams(
            dimension_semantics=("parallel",),      # rows independent -> megacore
            vmem_limit_bytes=vmem_limit),
    )(x_p, w_t, hb_p)

    return out_p[:n, :dout]


# ---------------------------------------------------------------------------
# Pure-JAX reference (mirrors the PyTorch PoincareBall manifold math).
# ---------------------------------------------------------------------------
def hyp_linear_ref(x, weight, bias, c, use_bias=True):
    c = jnp.float32(c)
    sqrt_c = jnp.sqrt(c)
    x_norm = _norm(x)
    mx = x @ weight.T
    mx_norm = _norm(mx)
    res_c = jnp.tanh(mx_norm / x_norm * _artanh(sqrt_c * x_norm)) * mx / (mx_norm * sqrt_c)
    mv = jnp.where(jnp.all(mx == 0.0, axis=-1, keepdims=True), 0.0, res_c)
    res = _proj(mv, sqrt_c)
    if use_bias:
        b = bias.reshape(1, -1)
        b_norm = _norm(b)
        hyp_bias = _proj(jnp.tanh(sqrt_c * b_norm) * b / (sqrt_c * b_norm), sqrt_c)
        x2 = jnp.sum(res * res, -1, keepdims=True)
        y2 = jnp.sum(hyp_bias * hyp_bias, -1, keepdims=True)
        xy = jnp.sum(res * hyp_bias, -1, keepdims=True)
        num = (1 + 2 * c * xy + c * y2) * res + (1 - c * x2) * hyp_bias
        denom = jnp.maximum(1 + 2 * c * xy + c * c * x2 * y2, MIN_NORM)
        res = _proj(num / denom, sqrt_c)
    return res


if __name__ == "__main__":
    # Case 1: module-consistent small shapes (N=8 nodes, in=32, out=32).
    N, IN_DIM, OUT_DIM = 8, 32, 32
    C = 1.0

    key = jax.random.PRNGKey(0)
    kx, kw = jax.random.split(key)

    # Points inside the Poincare ball (small norm).
    x = 0.1 * jax.random.normal(kx, (N, IN_DIM), dtype=jnp.float32)
    # Xavier-uniform weight with gain sqrt(2).
    bound = math.sqrt(2.0) * math.sqrt(6.0 / (IN_DIM + OUT_DIM))
    weight = jax.random.uniform(kw, (OUT_DIM, IN_DIM), dtype=jnp.float32,
                                minval=-bound, maxval=bound)
    bias = jnp.zeros((OUT_DIM,), dtype=jnp.float32)   # init.constant_(bias, 0)

    # TODO(synk): F.dropout on the weight is a no-op in eval mode; training-mode
    # stochastic dropout mask is not implemented here.

    out = jax.block_until_ready(hyp_linear(x, weight, bias, C, use_bias=True))
    ref = hyp_linear_ref(x, weight, bias, C, use_bias=True)
    assert out.shape == (N, OUT_DIM)
    assert jnp.allclose(out, ref, atol=1e-5, rtol=1e-5), "mismatch vs reference (f32)"

    # Case 2: non-aligned shapes exercising lane padding + multi-tile row grid.
    N2, IN2, OUT2 = 40, 48, 80
    kx2, kw2, kb2 = jax.random.split(jax.random.PRNGKey(1), 3)
    x2 = 0.1 * jax.random.normal(kx2, (N2, IN2), dtype=jnp.float32)
    w2 = 0.3 * jax.random.normal(kw2, (OUT2, IN2), dtype=jnp.float32)
    b2 = 0.05 * jax.random.normal(kb2, (OUT2,), dtype=jnp.float32)

    out2 = jax.block_until_ready(hyp_linear(x2, w2, b2, C, use_bias=True, tm=16))
    ref2 = hyp_linear_ref(x2, w2, b2, C, use_bias=True)
    assert out2.shape == (N2, OUT2)
    assert jnp.allclose(out2, ref2, atol=1e-5, rtol=1e-5), "mismatch vs reference (padded)"

    # Case 3: bf16 MXU operands, f32 accumulation + f32 hyperbolic math.
    out2_bf = jax.block_until_ready(
        hyp_linear(x2, w2, b2, C, use_bias=True, tm=16, mxu_dtype=jnp.bfloat16))
    assert jnp.allclose(out2_bf, ref2, atol=3e-2, rtol=3e-2), "mismatch vs reference (bf16 MXU)"

    print("KERNEL_OK")
</pallas_src>

<mosaic_0001>
module attributes {stable_mosaic.version = 11 : i64} {
  func.func @hyplinear_kernel(%arg0: i32, %arg1: memref<8x128xf32, #tpu.memory_space<vmem>>, %arg2: memref<128x128xf32, #tpu.memory_space<vmem>>, %arg3: memref<1x128xf32, #tpu.memory_space<vmem>>, %arg4: memref<8x128xf32, #tpu.memory_space<vmem>>) attributes {dimension_semantics = [#tpu.dimension_semantics<parallel>], iteration_bounds = array<i64: 1>, scalar_prefetch = 0 : i64, scratch_operands = 0 : i64, tpu.core_type = #tpu.core_type<tc>, window_params = [{transform_indices = @transform_0, window_bounds = array<i64: 8, 128>}, {pipeline_mode = #tpu.pipeline_mode<synchronous>, transform_indices = @transform_1, window_bounds = array<i64: 128, 128>}, {pipeline_mode = #tpu.pipeline_mode<synchronous>, transform_indices = @transform_2, window_bounds = array<i64: 1, 128>}, {transform_indices = @transform_3, window_bounds = array<i64: 8, 128>}]} {
    %cst = arith.constant 1.000000e+00 : f32
    %0 = math.sqrt %cst : f32
    %c0 = arith.constant 0 : index
    %c0_0 = arith.constant 0 : index
    %1 = vector.load %arg1[%c0, %c0_0] : memref<8x128xf32, #tpu.memory_space<vmem>>, vector<8x128xf32>
    %c0_1 = arith.constant 0 : index
    %c0_2 = arith.constant 0 : index
    %2 = vector.load %arg2[%c0_1, %c0_2] : memref<128x128xf32, #tpu.memory_space<vmem>>, vector<128x128xf32>
    %cst_3 = arith.constant dense<0.000000e+00> : vector<8x128xf32>
    %3 = tpu.matmul %1, %2, %cst_3 {dimension_numbers = #tpu.dot_dimension_numbers<[1], [0], [0], [1], [0, 0, 1, 1], [], []>} : vector<8x128xf32>, vector<128x128xf32>, vector<8x128xf32> -> vector<8x128xf32>
    %4 = arith.mulf %1, %1 : vector<8x128xf32>
    %cst_4 = arith.constant dense<0.000000e+00> : vector<8xf32>
    %5 = vector.multi_reduction <add>, %4, %cst_4 [1] : vector<8x128xf32> to vector<8xf32>
    %6 = vector.shape_cast %5 : vector<8xf32> to vector<8x1xf32>
    %7 = math.sqrt %6 : vector<8x1xf32>
    %cst_5 = arith.constant 1.000000e-15 : f32
    %8 = vector.broadcast %cst_5 : f32 to vector<8x1xf32>
    %9 = arith.maximumf %7, %8 : vector<8x1xf32>
    %10 = arith.mulf %3, %3 : vector<8x128xf32>
    %cst_6 = arith.constant dense<0.000000e+00> : vector<8xf32>
    %11 = vector.multi_reduction <add>, %10, %cst_6 [1] : vector<8x128xf32> to vector<8xf32>
    %12 = vector.shape_cast %11 : vector<8xf32> to vector<8x1xf32>
    %13 = math.sqrt %12 : vector<8x1xf32>
    %cst_7 = arith.constant 1.000000e-15 : f32
    %14 = vector.broadcast %cst_7 : f32 to vector<8x1xf32>
    %15 = arith.maximumf %13, %14 : vector<8x1xf32>
    %16 = arith.divf %15, %9 : vector<8x1xf32>
    %17 = vector.broadcast %0 : f32 to vector<8x1xf32>
    %18 = arith.mulf %17, %9 : vector<8x1xf32>
    %cst_8 = arith.constant -1.000000e+00 : f32
    %cst_9 = arith.constant 1.000000e+00 : f32
    %19 = vector.broadcast %cst_8 : f32 to vector<8x1xf32>
    %20 = arith.maximumf %19, %18 : vector<8x1xf32>
    %21 = vector.broadcast %cst_9 : f32 to vector<8x1xf32>
    %22 = arith.minimumf %21, %20 : vector<8x1xf32>
    %cst_10 = arith.constant 1.000000e+00 : f32
    %23 = vector.broadcast %cst_10 : f32 to vector<8x1xf32>
    %24 = arith.addf %23, %22 : vector<8x1xf32>
    %cst_11 = arith.constant 1.000000e+00 : f32
    %25 = vector.broadcast %cst_11 : f32 to vector<8x1xf32>
    %26 = arith.subf %25, %22 : vector<8x1xf32>
    %27 = arith.divf %24, %26 : vector<8x1xf32>
    %28 = math.log %27 : vector<8x1xf32>
    %cst_12 = arith.constant 5.000000e-01 : f32
    %29 = vector.broadcast %cst_12 : f32 to vector<8x1xf32>
    %30 = arith.mulf %29, %28 : vector<8x1xf32>
    %31 = arith.mulf %16, %30 : vector<8x1xf32>
    %32 = math.tanh %31 : vector<8x1xf32>
    %33 = vector.broadcast %32 : vector<8x1xf32> to vector<8x128xf32>
    %34 = arith.mulf %33, %3 : vector<8x128xf32>
    %35 = vector.broadcast %0 : f32 to vector<8x1xf32>
    %36 = arith.mulf %15, %35 : vector<8x1xf32>
    %37 = vector.broadcast %36 : vector<8x1xf32> to vector<8x128xf32>
    %38 = arith.divf %34, %37 : vector<8x128xf32>
    %cst_13 = arith.constant 0.000000e+00 : f32
    %39 = vector.broadcast %cst_13 : f32 to vector<8x1xf32>
    %40 = arith.cmpf ole, %12, %39 : vector<8x1xf32>
    %cst_14 = arith.constant 0.000000e+00 : f32
    %41 = vector.shape_cast %40 : vector<8x1xi1> to vector<8x1xi1>
    %42 = vector.broadcast %41 : vector<8x1xi1> to vector<8x128xi1>
    %43 = vector.broadcast %cst_14 : f32 to vector<8x128xf32>
    %44 = arith.select %42, %43, %38 : vector<8x128xi1>, vector<8x128xf32>
    %45 = arith.mulf %44, %44 : vector<8x128xf32>
    %cst_15 = arith.constant dense<0.000000e+00> : vector<8xf32>
    %46 = vector.multi_reduction <add>, %45, %cst_15 [1] : vector<8x128xf32> to vector<8xf32>
    %47 = vector.shape_cast %46 : vector<8xf32> to vector<8x1xf32>
    %48 = math.sqrt %47 : vector<8x1xf32>
    %cst_16 = arith.constant 1.000000e-15 : f32
    %49 = vector.broadcast %cst_16 : f32 to vector<8x1xf32>
    %50 = arith.maximumf %48, %49 : vector<8x1xf32>
    %cst_17 = arith.constant 0.995999991 : f32
    %51 = arith.divf %cst_17, %0 : f32
    %52 = vector.broadcast %51 : f32 to vector<8x1xf32>
    %53 = arith.cmpf ogt, %50, %52 : vector<8x1xf32>
    %54 = vector.broadcast %50 : vector<8x1xf32> to vector<8x128xf32>
    %55 = arith.divf %44, %54 : vector<8x128xf32>
    %56 = vector.broadcast %51 : f32 to vector<8x128xf32>
    %57 = arith.mulf %55, %56 : vector<8x128xf32>
    %58 = vector.shape_cast %53 : vector<8x1xi1> to vector<8x1xi1>
    %59 = vector.broadcast %58 : vector<8x1xi1> to vector<8x128xi1>
    %60 = arith.select %59, %57, %44 : vector<8x128xi1>, vector<8x128xf32>
    %c0_18 = arith.constant 0 : index
    %c0_19 = arith.constant 0 : index
    %61 = vector.load %arg3[%c0_18, %c0_19] : memref<1x128xf32, #tpu.memory_space<vmem>>, vector<1x128xf32>
    %62 = arith.mulf %60, %60 : vector<8x128xf32>
    %cst_20 = arith.constant dense<0.000000e+00> : vector<8xf32>
    %63 = vector.multi_reduction <add>, %62, %cst_20 [1] : vector<8x128xf32> to vector<8xf32>
    %64 = vector.shape_cast %63 : vector<8xf32> to vector<8x1xf32>
    %65 = arith.mulf %61, %61 : vector<1x128xf32>
    %cst_21 = arith.constant dense<0.000000e+00> : vector<1xf32>
    %66 = vector.multi_reduction <add>, %65, %cst_21 [1] : vector<1x128xf32> to vector<1xf32>
    %67 = vector.shape_cast %66 : vector<1xf32> to vector<1x1xf32>
    %68 = vector.broadcast %61 : vector<1x128xf32> to vector<8x128xf32>
    %69 = arith.mulf %60, %68 : vector<8x128xf32>
    %cst_22 = arith.constant dense<0.000000e+00> : vector<8xf32>
    %70 = vector.multi_reduction <add>, %69, %cst_22 [1] : vector<8x128xf32> to vector<8xf32>
    %71 = vector.shape_cast %70 : vector<8xf32> to vector<8x1xf32>
    %cst_23 = arith.constant 2.000000e+00 : f32
    %cst_24 = arith.constant 1.000000e+00 : f32
    %72 = arith.mulf %cst_23, %cst_24 : f32
    %73 = vector.broadcast %72 : f32 to vector<8x1xf32>
    %74 = arith.mulf %73, %71 : vector<8x1xf32>
    %cst_25 = arith.constant 1.000000e+00 : f32
    %75 = vector.broadcast %cst_25 : f32 to vector<8x1xf32>
    %76 = arith.addf %75, %74 : vector<8x1xf32>
    %cst_26 = arith.constant 1.000000e+00 : f32
    %77 = vector.broadcast %cst_26 : f32 to vector<1x1xf32>
    %78 = arith.mulf %77, %67 : vector<1x1xf32>
    %79 = vector.broadcast %78 : vector<1x1xf32> to vector<8x1xf32>
    %80 = arith.addf %76, %79 : vector<8x1xf32>
    %81 = vector.broadcast %80 : vector<8x1xf32> to vector<8x128xf32>
    %82 = arith.mulf %81, %60 : vector<8x128xf32>
    %cst_27 = arith.constant 1.000000e+00 : f32
    %83 = vector.broadcast %cst_27 : f32 to vector<8x1xf32>
    %84 = arith.mulf %83, %64 : vector<8x1xf32>
    %cst_28 = arith.constant 1.000000e+00 : f32
    %85 = vector.broadcast %cst_28 : f32 to vector<8x1xf32>
    %86 = arith.subf %85, %84 : vector<8x1xf32>
    %87 = vector.broadcast %86 : vector<8x1xf32> to vector<8x128xf32>
    %88 = vector.broadcast %61 : vector<1x128xf32> to vector<8x128xf32>
    %89 = arith.mulf %87, %88 : vector<8x128xf32>
    %90 = arith.addf %82, %89 : vector<8x128xf32>
    %cst_29 = arith.constant 2.000000e+00 : f32
    %cst_30 = arith.constant 1.000000e+00 : f32
    %91 = arith.mulf %cst_29, %cst_30 : f32
    %92 = vector.broadcast %91 : f32 to vector<8x1xf32>
    %93 = arith.mulf %92, %71 : vector<8x1xf32>
    %cst_31 = arith.constant 1.000000e+00 : f32
    %94 = vector.broadcast %cst_31 : f32 to vector<8x1xf32>
    %95 = arith.addf %94, %93 : vector<8x1xf32>
    %cst_32 = arith.constant 1.000000e+00 : f32
    %cst_33 = arith.constant 1.000000e+00 : f32
    %96 = arith.mulf %cst_32, %cst_33 : f32
    %97 = vector.broadcast %96 : f32 to vector<8x1xf32>
    %98 = arith.mulf %97, %64 : vector<8x1xf32>
    %99 = vector.broadcast %67 : vector<1x1xf32> to vector<8x1xf32>
    %100 = arith.mulf %98, %99 : vector<8x1xf32>
    %101 = arith.addf %95, %100 : vector<8x1xf32>
    %cst_34 = arith.constant 1.000000e-15 : f32
    %102 = vector.broadcast %cst_34 : f32 to vector<8x1xf32>
    %103 = arith.maximumf %101, %102 : vector<8x1xf32>
    %104 = vector.broadcast %103 : vector<8x1xf32> to vector<8x128xf32>
    %105 = arith.divf %90, %104 : vector<8x128xf32>
    %106 = arith.mulf %105, %105 : vector<8x128xf32>
    %cst_35 = arith.constant dense<0.000000e+00> : vector<8xf32>
    %107 = vector.multi_reduction <add>, %106, %cst_35 [1] : vector<8x128xf32> to vector<8xf32>
    %108 = vector.shape_cast %107 : vector<8xf32> to vector<8x1xf32>
    %109 = math.sqrt %108 : vector<8x1xf32>
    %cst_36 = arith.constant 1.000000e-15 : f32
    %110 = vector.broadcast %cst_36 : f32 to vector<8x1xf32>
    %111 = arith.maximumf %109, %110 : vector<8x1xf32>
    %cst_37 = arith.constant 0.995999991 : f32
    %112 = arith.divf %cst_37, %0 : f32
    %113 = vector.broadcast %112 : f32 to vector<8x1xf32>
    %114 = arith.cmpf ogt, %111, %113 : vector<8x1xf32>
    %115 = vector.broadcast %111 : vector<8x1xf32> to vector<8x128xf32>
    %116 = arith.divf %105, %115 : vector<8x128xf32>
    %117 = vector.broadcast %112 : f32 to vector<8x128xf32>
    %118 = arith.mulf %116, %117 : vector<8x128xf32>
    %119 = vector.shape_cast %114 : vector<8x1xi1> to vector<8x1xi1>
    %120 = vector.broadcast %119 : vector<8x1xi1> to vector<8x128xi1>
    %121 = arith.select %120, %118, %105 : vector<8x128xi1>, vector<8x128xf32>
    %c0_38 = arith.constant 0 : index
    %c0_39 = arith.constant 0 : index
    %122 = vector.load %arg4[%c0_38, %c0_39] : memref<8x128xf32, #tpu.memory_space<vmem>>, vector<8x128xf32>
    tpu.vector_store %arg4[%c0_38, %c0_39], %121 {strides = array<i32>} : memref<8x128xf32, #tpu.memory_space<vmem>>, vector<8x128xf32>,
    return
  }
  func.func @transform_0(%arg0: i32) -> (i32, i32) {
    %c0_i32 = arith.constant 0 : i32
    %c0_i32_0 = arith.constant 0 : i32
    return %arg0, %c0_i32 : i32, i32
  }
  func.func @transform_1(%arg0: i32) -> (i32, i32) {
    %c0_i32 = arith.constant 0 : i32
    %c0_i32_0 = arith.constant 0 : i32
    %c0_i32_1 = arith.constant 0 : i32
    return %c0_i32, %c0_i32_0 : i32, i32
  }
  func.func @transform_2(%arg0: i32) -> (i32, i32) {
    %c0_i32 = arith.constant 0 : i32
    %c0_i32_0 = arith.constant 0 : i32
    %c0_i32_1 = arith.constant 0 : i32
    return %c0_i32, %c0_i32_0 : i32, i32
  }
  func.func @transform_3(%arg0: i32) -> (i32, i32) {
    %c0_i32 = arith.constant 0 : i32
    %c0_i32_0 = arith.constant 0 : i32
    return %arg0, %c0_i32 : i32, i32
  }
}

</mosaic_0001>

<bundles_post_ra>
// kernel: tpu_custom_call.1
= control target key start
LH: loop header
LB: loop body
LE: loop exit
PB: predicated region body
PF: predicated region fallthrough
CT: control target
= control target key end

     0   :  { %8 = vsyncpa [#allocation3], 0  ;;  %s446_s0 = inlined_call_operand.hbm [shape: f32[8,128], index: 0, kind: input, shape index: {}]   ;;  %s447_s1 = inlined_call_operand.hbm [shape: f32[128,128], index: 1, kind: input, shape index: {}]   ;;  %s448_s2 = inlined_call_operand.vmem [shape: f32[1,128], index: 2, kind: input, shape index: {}]   ;;  %s449_s3 = inlined_call_operand.hbm [shape: f32[8,128], index: 3, kind: output, shape index: {}]  }
   0x1   :  { %9 = vsyncpa [#allocation6], 0 }
   0x2   :  { %10 = vsyncpa [#allocation4], 0  ;;  %s407_s12 = smov [#allocation2]   ;;  %s408_s14 = smov [#allocation5]  }
   0x3   :  { %s17_s13 = sshll.u32 %s407_s12, 4  ;;  %s26_s15 = sshll.u32 %s408_s14, 4  ;;  %s18_s13 = int_to_ptr.vmem [resolvable:$true] %s17_s13  ;;  %s27_s15 = int_to_ptr.vmem [resolvable:$true] %s26_s15 }
   0x4   :  { %s349_s16 = scalar_lea.vmem %s18_s13, 128  ;;  %p354_p1 = scmp.lt.s32.totalorder %s18_s13, %s18_s13 }
   0x5   :  { %p350_p0 = scmp.ne.s32.totalorder %s18_s13, %s349_s16  ;;  %p355_p2 = scmp.lt.s32.totalorder %s349_s16, %s349_s16 }
   0x7   :  { %p356_p3 = por %p355_p2, %p354_p1 }
   0x9   :  { %p357_p4 = pnand %p356_p3, %p350_p0 }
   0xb   :  { %360 = shalt.err (!%p357_p4)
}
   0xc   :  { %20 = dma.hbm_to_vmem [thread:$0]  %s446_s0, 128, %s18_s13, [#allocation3]  }
   0xd   :  { %s369_s19 = scalar_lea.vmem %s27_s15, 2048  ;;  %p374_p6 = scmp.lt.s32.totalorder %s27_s15, %s27_s15 }
   0xe   :  { %p370_p5 = scmp.ne.s32.totalorder %s27_s15, %s369_s19  ;;  %p375_p7 = scmp.lt.s32.totalorder %s369_s19, %s369_s19 }
  0x10   :  { %p376_p8 = por %p375_p7, %p374_p6 }
  0x12   :  { %p377_p9 = pnand %p376_p8, %p370_p5 }
  0x14   :  { %380 = shalt.err (!%p377_p9)
}
  0x15   :  { %s409_s20 = smov 128   ;;  %s410_s21 = smov 8  }
  0x16   :  { %32 = dma.hbm_to_vmem [thread:$0]  %s447_s1, 2048, %s27_s15, [#allocation6], %s409_s20, %s409_s20, %s410_s21  }
  0x17   :  { %401 = dma.done.wait [#allocation3], 128  }
  0x18   :  { %402 = vsyncadd [#allocation3], 4294967168 }
  0x19   :  { %403 = dma.done.wait [#allocation6], 2048  }
  0x1a   :  { %404 = vsyncadd [#allocation6], 4294965248  ;;  %v411_v0 = vmov 0.0   ;;  %vm412_vm0 = vmmov 0   ;;  %v57_v1 = vld [vmem:[#allocation5 + $0x78] sm:$0xff]  ;;  %v56_v2 = vld [vmem:[#allocation5 + $0x70] sm:$0xff]  ;;  %v198_v63 = vlaneseq }
  0x1b   :  { %275 = vmatprep.subr.mxu0 %v411_v0  ;;  %307 = vmatprep.mubr.msk.f32.mxu0 %vm412_vm0, %v411_v0  ;;  %v55_v3 = vld [vmem:[#allocation5 + $0x68] sm:$0xff]  ;;  %v54_v4 = vld [vmem:[#allocation5 + $0x60] sm:$0xff]  ;;  %v41_v5 = vld [vmem:[#allocation2] sm:$0xff]  ;;  %vm193_vm6 = vcmask 1040384  }
  0x1c   :  { %276 = vmatpush3.msra.mxu0 %v57_v1  ;;  %v53_v6 = vld [vmem:[#allocation5 + $0x58] sm:$0xff]  ;;  %v128_v7 = vmul.f32 %v41_v5, %v41_v5  ;;  %v52_v8 = vld [vmem:[#allocation5 + $0x50] sm:$0xff]  ;;  %v51_v9 = vld [vmem:[#allocation5 + $0x48] sm:$0xff] }
  0x1d   :  { %277 = vmatprep.subr.mxu0 %v411_v0  ;;  %v50_v10 = vld [vmem:[#allocation5 + $0x40] sm:$0xff]  ;;  %v49_v11 = vld [vmem:[#allocation5 + $0x38] sm:$0xff]  ;;  %v48_v12 = vld [vmem:[#allocation5 + $0x30] sm:$0xff] }
  0x1e   :  { %278 = vmatpush3.msra.mxu0 %v56_v2  ;;  %129 = vadd.xlane.f32.xlu0 %v128_v7  ;;  %v47_v13 = vld [vmem:[#allocation5 + $0x28] sm:$0xff]  ;;  %v46_v14 = vld [vmem:[#allocation5 + $0x20] sm:$0xff]  ;;  %v45_v15 = vld [vmem:[#allocation5 + $0x18] sm:$0xff] }
  0x1f   :  { %279 = vmatprep.subr.mxu0 %v411_v0  ;;  %v44_v16 = vld [vmem:[#allocation5 + $0x10] sm:$0xff]  ;;  %v43_v17 = vld [vmem:[#allocation5 + $0x8] sm:$0xff]  ;;  %v42_v18 = vld [vmem:[#allocation5] sm:$0xff] }
  0x20   :  { %280 = vmatpush3.msra.mxu0 %v55_v3  ;;  %v188_v53 = vld [vmem:[%s448_s2] sm:$0x1]  ;;  %s413_s2 = smov [#allocation7]  }
  0x21   :  { %281 = vmatprep.subr.mxu0 %v411_v0  ;;  %v192_v54 = vmul.f32 %v188_v53, %v188_v53  ;;  %s247_s24 = sshll.u32 %s413_s2, 4  ;;  %s248_s24 = int_to_ptr.vmem [resolvable:$true] %s247_s24 }
  0x22   :  { %282 = vmatpush3.msra.mxu0 %v54_v4  ;;  %s381_s25 = scalar_lea.vmem %s248_s24, 128  ;;  %p386_p11 = scmp.lt.s32.totalorder %s248_s24, %s248_s24 }
  0x23   :  { %283 = vmatprep.subr.mxu0 %v411_v0  ;;  %v194_v55 = vsel %vm193_vm6, %v192_v54, 0.0  ;;  %p382_p10 = scmp.ne.s32.totalorder %s248_s24, %s381_s25  ;;  %p387_p12 = scmp.lt.s32.totalorder %s381_s25, %s381_s25 }
  0x24   :  { %284 = vmatpush3.msra.mxu0 %v53_v6 }
  0x25   :  { %285 = vmatprep.subr.mxu0 %v411_v0  ;;  %p388_p13 = por %p387_p12, %p386_p11 }
  0x26   :  { %286 = vmatpush3.msra.mxu0 %v52_v8 }
  0x27   :  { %287 = vmatprep.subr.mxu0 %v411_v0  ;;  %p389_p0 = pnand %p388_p13, %p382_p10 }
  0x28   :  { %288 = vmatpush3.msra.mxu0 %v51_v9 }
  0x29   :  { %289 = vmatprep.subr.mxu0 %v411_v0 }
  0x2a   :  { %290 = vmatpush3.msra.mxu0 %v50_v10 }
  0x2b   :  { %291 = vmatprep.subr.mxu0 %v411_v0 }
  0x2c   :  { %292 = vmatpush3.msra.mxu0 %v49_v11 }
  0x2d   :  { %293 = vmatprep.subr.mxu0 %v411_v0 }
  0x2e   :  { %294 = vmatpush3.msra.mxu0 %v48_v12 }
  0x2f   :  { %295 = vmatprep.subr.mxu0 %v411_v0 }
  0x30   :  { %296 = vmatpush3.msra.mxu0 %v47_v13 }
  0x31   :  { %297 = vmatprep.subr.mxu0 %v411_v0 }
  0x32   :  { %298 = vmatpush3.msra.mxu0 %v46_v14 }
  0x33   :  { %299 = vmatprep.subr.mxu0 %v411_v0 }
  0x34   :  { %300 = vmatpush3.msra.mxu0 %v45_v15 }
  0x35   :  { %301 = vmatprep.subr.mxu0 %v411_v0 }
  0x36   :  { %302 = vmatpush3.msra.mxu0 %v44_v16 }
  0x37   :  { %303 = vmatprep.subr.mxu0 %v411_v0 }
  0x38   :  { %304 = vmatpush3.msra.mxu0 %v43_v17 }
  0x39   :  { %305 = vmatprep.subr.mxu0 %v411_v0  ;;  %v199_v0 = vshrl.u32 %v198_v63, 7 }
  0x3a   :  { %306 = vmatpush3.msra.mxu0 %v42_v18 }
  0x3b   :  { %308 = vmatmul.mubr.f32.vlgmr.msra.gmra.mxu0 %v41_v5  ;;  %v200_v1 = vsub.s32 0, %v199_v0 }
  0x3d   :  { %v201_v4 = vrot.slane %v188_v53, %v200_v1 }
  0xa7   :  { %v130_v22 = vpop.xlane.xlu0 %129 }
  0xa8   :  { %317 = vrsqrt.f32 %v130_v22  ;;  %vm133_vm1 = vcmp.eq.f32.partialorder %v130_v22, inf  ;;  %v136_v25 = vand.u32 2147483648, %v130_v22  ;;  %vm135_vm2 = vcmp.eq.f32.partialorder %v130_v22, 0.0 }
  0xb5   :  { %v318_v23 = vpop.eup %317 }
  0xb6   :  { %v132_v24 = vmul.f32 %v318_v23, %v130_v22 }
  0xb8   :  { %v134_v26 = vsel %vm133_vm1, %v130_v22, %v132_v24 }
  0xb9   :  { %v137_v27 = vsel %vm135_vm2, %v136_v25, %v134_v26 }
  0xba   :  { %v138_v28 = vmax.f32 %v137_v27, 1e-15 }
  0xbc   :  { %v257_v29 = vclamps-f32 %v138_v28, 1.0 }
  0xbe   :  { %v155_v30 = vsub.f32 1.0, %v257_v29  ;;  %v154_v31 = vadd.f32 1.0, %v257_v29 }
  0xc0   :  { %319 = vrcp.f32 %v155_v30 }
  0xcd   :  { %v320_v32 = vpop.eup %319 }
  0xce   :  { %v157_v33 = vmul.f32 %v320_v32, %v154_v31 }
  0xd0   :  { %321 = vlog2.f32 %v157_v33 }
  0xdd   :  { %v322_v35 = vpop.eup %321 }
  0xde   :  { %v159_v40 = vmul.f32 0.6931472, %v322_v35 }
  0xe0   :  { %v160_v45 = vmul.f32 0.5, %v159_v40 }
  0xfb   :  { %v124_v19 = vpop.f32.mrf.mxu0 }
  0xfc   :  { %v139_v20 = vmul.f32 %v124_v19, %v124_v19 }
  0xfd   :  { %v309_v21 = vpop.f32.mrf.mxu0 }
  0xfe   :  { %140 = vadd.xlane.f32.xlu0 %v139_v20 }
 0x187   :  { %v141_v34 = vpop.xlane.xlu0 %140 }
 0x188   :  { %323 = vrsqrt.f32 %v141_v34  ;;  %vm144_vm3 = vcmp.eq.f32.partialorder %v141_v34, inf  ;;  %v147_v38 = vand.u32 2147483648, %v141_v34  ;;  %vm146_vm4 = vcmp.eq.f32.partialorder %v141_v34, 0.0 }
 0x189   :  { %325 = vrcp.f32 %v138_v28  ;;  %vm166_vm5 = vcmp.le.f32.partialorder %v141_v34, 0.0 }
 0x195   :  { %v324_v36 = vpop.eup %323 }
 0x196   :  { %v143_v37 = vmul.f32 %v324_v36, %v141_v34  ;;  %v326_v43 = vpop.eup %325 }
 0x198   :  { %v145_v39 = vsel %vm144_vm3, %v141_v34, %v143_v37 }
 0x199   :  { %v148_v41 = vsel %vm146_vm4, %v147_v38, %v145_v39 }
 0x19a   :  { %v149_v42 = vmax.f32 %v148_v41, 1e-15 }
 0x19c   :  { %v151_v44 = vmul.f32 %v326_v43, %v149_v42 }
 0x19e   :  { %v161_v46 = vmul.f32 %v160_v45, %v151_v44 }
 0x1a0   :  { %327 = vtanh.f32 %v161_v46 }
 0x1a1   :  { %329 = vrcp.f32 %v149_v42 }
 0x1ad   :  { %v328_v47 = vpop.eup %327 }
 0x1ae   :  { %v163_v48 = vmul.f32 %v328_v47, %v124_v19  ;;  %v330_v49 = vpop.eup %329 }
 0x1b0   :  { %v165_v50 = vmul.f32 %v330_v49, %v163_v48 }
 0x1b2   :  { %v169_v51 = vsel %vm166_vm5, 0.0, %v165_v50 }
 0x1b3   :  { %v170_v52 = vmul.f32 %v169_v51, %v169_v51 }
 0x1b5   :  { %171 = vadd.xlane.f32.xlu1 %v170_v52 }
 0x1b9   :  { %195 = vadd.xlane.f32.xlu1 %v194_v55 }
 0x23e   :  { %v172_v56 = vpop.xlane.xlu1 %171 }
 0x23f   :  { %331 = vrsqrt.f32 %v172_v56  ;;  %vm175_vm7 = vcmp.eq.f32.partialorder %v172_v56, inf  ;;  %v178_v59 = vand.u32 2147483648, %v172_v56  ;;  %vm177_vm8 = vcmp.eq.f32.partialorder %v172_v56, 0.0 }
 0x242   :  { %v196_v9 = vpop.xlane.xlu1 %195 }
 0x243   :  { %v211_v10 = vrot.slane %v196_v9, %v200_v1 }
 0x24c   :  { %v332_v57 = vpop.eup %331 }
 0x24d   :  { %v174_v58 = vmul.f32 %v332_v57, %v172_v56 }
 0x24f   :  { %v176_v60 = vsel %vm175_vm7, %v172_v56, %v174_v58 }
 0x250   :  { %v179_v61 = vsel %vm177_vm8, %v178_v59, %v176_v60 }
 0x251   :  { %v180_v62 = vmax.f32 %v179_v61, 1e-15 }
 0x253   :  { %333 = vrcp.f32 %v180_v62  ;;  %vm181_vm9 = vcmp.gt.f32.partialorder %v180_v62, 0.996 }
 0x260   :  { %v334_v2 = vpop.eup %333 }
 0x261   :  { %v183_v3 = vmul.f32 %v334_v2, %v169_v51 }
 0x263   :  { %v184_v5 = vmul.f32 0.996, %v183_v3 }
 0x265   :  { %v187_v6 = vsel %vm181_vm9, %v184_v5, %v169_v51 }
 0x266   :  { %v203_v7 = vmul.f32 %v201_v4, %v187_v6  ;;  %v189_v8 = vmul.f32 %v187_v6, %v187_v6 }
 0x268   :  { %204 = vadd.xlane.f32.xlu0 %v203_v7  ;;  %190 = vadd.xlane.f32.xlu1 %v189_v8 }
 0x2f1   :  { %v205_v11 = vpop.xlane.xlu0 %204  ;;  %v191_v12 = vpop.xlane.xlu1 %190 }
 0x2f2   :  { %v206_v13 = vmul.f32 2.0, %v205_v11  ;;  %v217_v15 = vmul.f32 %v211_v10, %v191_v12  ;;  %v214_v19 = vsub.f32 1.0, %v191_v12 }
 0x2f4   :  { %v207_v14 = vadd.f32 1.0, %v206_v13  ;;  %v215_v21 = vmul.f32 %v214_v19, %v201_v4 }
 0x2f6   :  { %v218_v16 = vadd.f32 %v217_v15, %v207_v14  ;;  %v212_v18 = vadd.f32 %v211_v10, %v207_v14 }
 0x2f8   :  { %v219_v17 = vmax.f32 %v218_v16, 1e-15  ;;  %v213_v20 = vmul.f32 %v212_v18, %v187_v6 }
 0x2fa   :  { %335 = vrcp.f32 %v219_v17  ;;  %v216_v22 = vadd.f32 %v215_v21, %v213_v20 }
 0x307   :  { %v336_v23 = vpop.eup %335 }
 0x308   :  { %v221_v24 = vmul.f32 %v336_v23, %v216_v22 }
 0x30a   :  { %v222_v25 = vmul.f32 %v221_v24, %v221_v24 }
 0x30c   :  { %223 = vadd.xlane.f32.xlu0 %v222_v25 }
 0x395   :  { %v224_v26 = vpop.xlane.xlu0 %223 }
 0x396   :  { %337 = vrsqrt.f32 %v224_v26  ;;  %vm227_vm10 = vcmp.eq.f32.partialorder %v224_v26, inf  ;;  %v230_v29 = vand.u32 2147483648, %v224_v26  ;;  %vm229_vm11 = vcmp.eq.f32.partialorder %v224_v26, 0.0 }
 0x3a3   :  { %v338_v27 = vpop.eup %337 }
 0x3a4   :  { %v226_v28 = vmul.f32 %v338_v27, %v224_v26 }
 0x3a6   :  { %v228_v30 = vsel %vm227_vm10, %v224_v26, %v226_v28 }
 0x3a7   :  { %v231_v31 = vsel %vm229_vm11, %v230_v29, %v228_v30 }
 0x3a8   :  { %v232_v32 = vmax.f32 %v231_v31, 1e-15 }
 0x3aa   :  { %339 = vrcp.f32 %v232_v32  ;;  %vm233_vm12 = vcmp.gt.f32.partialorder %v232_v32, 0.996 }
 0x3b7   :  { %v340_v33 = vpop.eup %339 }
 0x3b8   :  { %v235_v34 = vmul.f32 %v340_v33, %v221_v24 }
 0x3ba   :  { %v236_v35 = vmul.f32 0.996, %v235_v34 }
 0x3bc   :  { %v239_v36 = vsel %vm233_vm12, %v236_v35, %v221_v24 }
 0x3bd   :  { %240 = vst [vmem:[#allocation7] sm:$0xff] %v239_v36 }
 0x3be   :  { %392 = shalt.err (!%p389_p0)
}
 0x3bf   :  { %250 = dma.vmem_to_hbm [thread:$0]  %s248_s24, 128, %s449_s3, [#allocation4]  }
 0x3c0   :  { %405 = dma.done.wait [#allocation4], 128  }
 0x3c1   :  { %406 = vsyncadd [#allocation4], 4294967168 }
 0x3c2   :  { %254 = vsyncpa [#allocation3], 1 }
 0x3c3   :  { %255 = vsyncpa [#allocation6], 1 }
 0x3c4   :  { %256 = vsyncpa [#allocation4], 1 }

</bundles_post_ra>
